<compile_context>
chip_gen: v7x
topology: tpu7x:2x2x1
jax: 0.10.0
libtpu: 0.0.40
codegen_flags: <defaults>
</compile_context>

<pallas_src>
import jax
import jax.numpy as jnp
from jax.experimental import pallas as pl
from jax.experimental.pallas import tpu as pltpu


# --------------------------------------------------------------------------- #
# Kernel bodies (pure transpose — no fused casts/scaling; keeps the single
# vst slot on v5e hidden under the HBM DMA)
# --------------------------------------------------------------------------- #
def _permute_tile_kernel(x_ref, o_ref):
    # Batch dim is squeezed out: x_ref is (tn, tc), o_ref is (tc, tn).
    o_ref[...] = jnp.swapaxes(x_ref[...], 0, 1)


def _permute_batch_kernel(x_ref, o_ref):
    # x_ref: (tb, N, C), o_ref: (tb, C, N) — several whole batches per step.
    o_ref[...] = jnp.swapaxes(x_ref[...], 1, 2)


# --------------------------------------------------------------------------- #
# Tiling helper
# --------------------------------------------------------------------------- #
def _pick_tile(d: int, max_tile: int) -> int:
    """Tile extent along one transposed axis.

    * d <= max_tile : use the full dim (full-extent blocks are always legal,
      even when unaligned) — one block along this axis.
    * d >  max_tile : use the largest 128-multiple tile <= max_tile and rely
      on a cdiv grid; Pallas masks the ragged edge block (no wrapper padding).
    """
    if d <= max_tile:
        return d
    return max(128, (max_tile // 128) * 128)


# --------------------------------------------------------------------------- #
# Wrapper
# --------------------------------------------------------------------------- #
def permute_021(
    x: jax.Array,
    *,
    max_tile=None,                   # per-axis tile cap for the tiled path
    small_slab_bytes: int = 1 << 20, # slabs below this use the batched path
    batch_block_budget: int = 2 << 20,
) -> jax.Array:
    """Equivalent of torch.permute(x, (0, 2, 1)) for a 3-D array (B, N, C)."""
    assert x.ndim == 3, f"expected (B, N, C), got {x.shape}"
    B, N, C = x.shape
    itemsize = jnp.dtype(x.dtype).itemsize
    slab_bytes = N * C * itemsize

    # Keep each tile at ~1-2 MiB regardless of dtype so the ~0.35 us/step
    # pipeline overhead stays amortized (sub-32-bit dtypes get wider tiles).
    # On v7x, passing max_tile=1024 for f32 amortizes overhead further against
    # its ~3.2 TB/s HBM; 512 is the safe cross-generation default.
    if max_tile is None:
        max_tile = 512 if itemsize >= 4 else 1024

    cparams_kwargs = dict(vmem_limit_bytes=32 * 1024 * 1024)

    # ---------------- small-slab path: amortize batches per grid step -------
    if slab_bytes <= small_slab_bytes:
        tb = max(1, batch_block_budget // max(1, slab_bytes))
        if B >= 2:
            # >=2 grid steps so both v7x TensorCores get work.
            tb = min(tb, pl.cdiv(B, 2))
        tb = min(tb, B)
        grid_b = pl.cdiv(B, tb)          # ragged last batch block is masked
        return pl.pallas_call(
            _permute_batch_kernel,
            out_shape=jax.ShapeDtypeStruct((B, C, N), x.dtype),
            grid_spec=pltpu.PrefetchScalarGridSpec(
                num_scalar_prefetch=0,
                grid=(grid_b,),
                in_specs=[pl.BlockSpec((tb, N, C), lambda b: (b, 0, 0))],
                out_specs=pl.BlockSpec((tb, C, N), lambda b: (b, 0, 0)),
            ),
            compiler_params=pltpu.CompilerParams(
                dimension_semantics=("parallel",), **cparams_kwargs
            ),
        )(x)

    # ---------------- tiled path: 3-D grid over (B, C-tiles, N-tiles) -------
    tn = _pick_tile(N, max_tile)
    tc = _pick_tile(C, max_tile)
    n_blocks, c_blocks = pl.cdiv(N, tn), pl.cdiv(C, tc)

    # v7x megacore: guarantee >=2 grid steps; if a single-block grid would
    # leave one TensorCore idle, halve the larger tile (128-aligned).
    if B * c_blocks * n_blocks < 2:
        if tc >= tn and tc > 128:
            tc = max(128, ((tc // 2) // 128) * 128)
        elif tn > 128:
            tn = max(128, ((tn // 2) // 128) * 128)
        n_blocks, c_blocks = pl.cdiv(N, tn), pl.cdiv(C, tc)

    # Innermost grid axis (i) walks the output's lane dim -> contiguous
    # writeback DMAs along the output's last dimension.
    grid = (B, c_blocks, n_blocks)

    return pl.pallas_call(
        _permute_tile_kernel,
        out_shape=jax.ShapeDtypeStruct((B, C, N), x.dtype),
        grid_spec=pltpu.PrefetchScalarGridSpec(
            num_scalar_prefetch=0,
            grid=grid,
            in_specs=[
                pl.BlockSpec(
                    (pl.Squeezed(), tn, tc), lambda b, j, i: (b, i, j)
                )
            ],
            out_specs=pl.BlockSpec(
                (pl.Squeezed(), tc, tn), lambda b, j, i: (b, j, i)
            ),
        ),
        compiler_params=pltpu.CompilerParams(
            dimension_semantics=("parallel", "parallel", "parallel"),
            **cparams_kwargs,
        ),
    )(x)


# --------------------------------------------------------------------------- #
# Self-test
# --------------------------------------------------------------------------- #
if __name__ == "__main__":
    # Primary (small) shape consistent with the module: (batch=2, seq=8, hidden=32)
    key = jax.random.PRNGKey(0)
    B, N, C = 2, 8, 32
    x = jax.random.normal(key, (B, N, C), dtype=jnp.float32)

    out = permute_021(x)
    jax.block_until_ready(out)

    ref = jnp.transpose(x, (0, 2, 1))
    assert out.shape == (B, C, N), out.shape
    assert jnp.array_equal(out, ref), "mismatch vs reference (small path)"

    # Ragged-batch small-path check (prime B -> masked last batch block).
    x1 = jax.random.normal(jax.random.PRNGKey(2), (3, 8, 32), dtype=jnp.float32)
    out1 = permute_021(x1)
    jax.block_until_ready(out1)
    assert out1.shape == (3, 32, 8), out1.shape
    assert jnp.array_equal(out1, jnp.transpose(x1, (0, 2, 1))), (
        "mismatch vs reference (ragged-batch small path)"
    )

    # Tiled-path check: non-128-aligned dims exercise masked ragged edge
    # blocks (no wrapper padding / slicing anymore).
    x2 = jax.random.normal(jax.random.PRNGKey(1), (2, 520, 768), dtype=jnp.float32)
    out2 = permute_021(x2)
    jax.block_until_ready(out2)
    assert out2.shape == (2, 768, 520), out2.shape
    assert jnp.array_equal(out2, jnp.transpose(x2, (0, 2, 1))), (
        "mismatch vs reference (tiled path)"
    )

    print("KERNEL_OK")
</pallas_src>

<mosaic_0001>
module attributes {stable_mosaic.version = 11 : i64} {
  func.func @_permute_batch_kernel(%arg0: i32, %arg1: memref<1x8x32xf32, #tpu.memory_space<vmem>>, %arg2: memref<1x32x8xf32, #tpu.memory_space<vmem>>) attributes {dimension_semantics = [#tpu.dimension_semantics<parallel>], iteration_bounds = array<i64: 2>, scalar_prefetch = 0 : i64, scratch_operands = 0 : i64, tpu.core_type = #tpu.core_type<tc>, window_params = [{transform_indices = @transform_0, window_bounds = array<i64: 1, 8, 32>}, {transform_indices = @transform_1, window_bounds = array<i64: 1, 32, 8>}]} {
    %c0 = arith.constant 0 : index
    %c0_0 = arith.constant 0 : index
    %c0_1 = arith.constant 0 : index
    %0 = vector.load %arg1[%c0, %c0_0, %c0_1] : memref<1x8x32xf32, #tpu.memory_space<vmem>>, vector<1x8x32xf32>
    %1 = tpu.transpose %0, [0, 2, 1] : vector<1x8x32xf32> -> vector<1x32x8xf32>
    %c0_2 = arith.constant 0 : index
    %c0_3 = arith.constant 0 : index
    %c0_4 = arith.constant 0 : index
    %2 = vector.load %arg2[%c0_2, %c0_3, %c0_4] : memref<1x32x8xf32, #tpu.memory_space<vmem>>, vector<1x32x8xf32>
    tpu.vector_store %arg2[%c0_2, %c0_3, %c0_4], %1 {strides = array<i32>} : memref<1x32x8xf32, #tpu.memory_space<vmem>>, vector<1x32x8xf32>,
    return
  }
  func.func @transform_0(%arg0: i32) -> (i32, i32, i32) {
    %c0_i32 = arith.constant 0 : i32
    %c0_i32_0 = arith.constant 0 : i32
    %c0_i32_1 = arith.constant 0 : i32
    return %arg0, %c0_i32, %c0_i32_0 : i32, i32, i32
  }
  func.func @transform_1(%arg0: i32) -> (i32, i32, i32) {
    %c0_i32 = arith.constant 0 : i32
    %c0_i32_0 = arith.constant 0 : i32
    %c0_i32_1 = arith.constant 0 : i32
    return %arg0, %c0_i32, %c0_i32_0 : i32, i32, i32
  }
}

</mosaic_0001>

<bundles_post_ra>
// kernel: tpu_custom_call.1
= control target key start
LH: loop header
LB: loop body
LE: loop exit
PB: predicated region body
PF: predicated region fallthrough
CT: control target
= control target key end

     0   :  { %6 = vsyncpa [#allocation3], 0  ;;  %s475_s0 = inlined_call_operand.hbm [shape: f32[2,8,32], index: 0, kind: input, shape index: {}]   ;;  %s476_s1 = inlined_call_operand.vmem [shape: f32[2,32,8], index: 1, kind: output, shape index: {}]  }
   0x1   :  { %8 = vsyncpa [#allocation3 + $0x1], 0  ;;  %s368_s6 = smov 0   ;;  %s370_s7 = smov 0  }
   0x2   :  { %s372_s8 = smov 0   ;;  %s374_s9 = smov 0  }
   0x3 LB: > { %s387_s10 = sadd.s32 4294967295, %s355_s9   ;;  %s390_s11 = sadd.s32 1, %s355_s9   ;;  %s355_s9 = sphi %s374_s9, %s484_s9   ;;  %s351_s8 = sphi %s372_s8, %s483_s8   ;;  %s347_s7 = sphi %s370_s7, %s482_s7   ;;  %s343_s6 = sphi %s368_s6, %s481_s6  }
   0x4   : > { %s18_s12 = ssub.s32 %s355_s9, %s390_s11  ;;  %s21_s13 = sadd.s32 1, %s351_s8 }
   0x5   : > { %p19_p0 = scmp.eq.s32.totalorder %s18_s12, 0  ;;  %p28_p1 = scmp.ne.s32.totalorder %s351_s8, %s347_s7 }
   0x6   : > { %p29_p2 = scmp.eq.s32.totalorder %s355_s9, 0  ;;  %p34_p3 = scmp.ne.s32.totalorder %s347_s7, %s343_s6 }
   0x7   : > { %s400_s14 = scalar_select %p19_p0, %s351_s8, %s21_s13  }
   0x8   : > { %p30_p4 = por %p29_p2, %p28_p1  ;;  %p35_p5 = scmp.eq.s32.totalorder %s387_s10, 0 }
   0x9   : > { %p257_p6 = scmp.lt.s32.totalorder %s355_s9, 2  ;;  %s84_s16 = sand.u32 1, %s351_s8  }
   0xa   : > { %p404_p7 = por %p35_p5, %p34_p3  ;;  %s242_s17 = sshll.u32 %s84_s16, 3 }
   0xb   : > { %s243_s18 = sshll.u32 %s355_s9, 7  ;;  %s88_s22 = scalar_lea.vmem [#allocation2], %s242_s17 }
   0xc   : > { %s413_s21 = scalar_lea.hbm %s475_s0, %s243_s18  ;;  %s95_s23 = sshll.u32 %s88_s22, 4  ;;  %s415_s23 = int_to_ptr.vmem [resolvable:$true] %s95_s23 }
   0xd   : > { %p417_p8 = pnand %p257_p6, %p30_p4  ;;  %s85_s25 = scalar_lea.sflag [#allocation3], %s84_s16 }
   0xe   : > { %s291_s26 = scalar_lea.hbm %s413_s21, 128  ;;  %s296_s29 = scalar_lea.hbm %s475_s0, 256 }
   0xf   : > { %p292_p11 = scmp.ne.s32.totalorder %s413_s21, %s291_s26  ;;  %p293_p12 = pneg %p417_p8 }
  0x10   : > { %p297_p1 = scmp.lt.u32.totalorder %s413_s21, %s475_s0  ;;  %p298_p2 = scmp.lt.u32.totalorder %s296_s29, %s291_s26 }
  0x11   : > { %p294_p13 = pnand %p293_p12, %p292_p11  ;;  %p300_p4 = scmp.lt.u32.totalorder %s291_s26, %s413_s21 }
  0x12   : > { %p299_p3 = por %p298_p2, %p297_p1 }
  0x13   : > { %p295_p0 = pneg %p294_p13 }
  0x14   : > { %p301_p5 = por %p300_p4, %p299_p3 }
  0x16   : > { %p302_p6 = pnand %p301_p5, %p295_p0 }
  0x18   : > { %305 = shalt.err (!%p302_p6)
}
  0x19   : > { %s306_s3 = scalar_lea.vmem %s415_s23, 128  ;;  %s357_s4 = smov [#allocation2]  }
  0x1a   : > { %p307_p11 = scmp.ne.s32.totalorder %s415_s23, %s306_s3  ;;  %s311_s5 = sshll.u32 %s357_s4, 4  ;;  %s312_s5 = int_to_ptr.vmem [resolvable:$false] %s311_s5 }
  0x1b   : > { %s313_s6 = scalar_lea.vmem %s312_s5, 256  ;;  %p314_p10 = scmp.lt.s32.totalorder %s415_s23, %s312_s5 }
  0x1c   : > { %p309_p13 = pnand %p307_p11, %p293_p12  ;;  %p315_p1 = scmp.lt.s32.totalorder %s313_s6, %s306_s3 }
  0x1e   : > { %p310_p9 = pneg %p309_p13  ;;  %p316_p2 = por %p315_p1, %p314_p10 }
  0x20   : > { %p317_p3 = pnand %p316_p2, %p310_p9 }
  0x22   : > { %320 = shalt.err (!%p317_p3)
}
  0x23   : > { %256 = dma.hbm_to_vmem [thread:$0]  (!%p417_p8), %s413_s21, 128, %s415_s23, %s85_s25  }
  0x24   : > { %p479_p0 = scmp.lt.s32.totalorder %s355_s9, 3  ;;  %p480_p4 = scmp.ge.s32.totalorder %s355_s9, 1 }
  0x26   : > { %p101_p12 = pnand %p480_p4, %p479_p0 }
  0x27   : > { %s106_s12 = sand.u32 (!%p101_p12), 1, %s347_s7  }
  0x28   : > { %104 = sbr.rel (%p101_p12) target bundleno = 191 (0xbf), region = 24  ;;  %s245_s13 = sshll.u32 (!%p101_p12), %s106_s12, 3 }
  0x29   : > { %s107_s16 = scalar_lea.sflag (!%p101_p12), [#allocation3], %s106_s12  ;;  %s110_s17 = scalar_lea.vmem (!%p101_p12), [#allocation2], %s245_s13 }
  0x2f   : > { %338 = dma.done.wait (%p404_p7), %s107_s16, 128  }
  0x30   : > { %340 = vsyncadd (%p404_p7), %s107_s16, 4294967168  ;;  %v134_v0 = vld [vmem:[%s110_s17] sm:$0xff]  ;;  %p129_p8 = scmp.lt.s32.totalorder %s387_s10, 1  ;;  %vm167_vm0 = vcmask 64512  }
  0x31   : > { %135 = vxpose.xlu0.b32.start.end [1/1] (short) (narrow) %v134_v0, 32 }
  0x32   : > { %s486_s10 = smov (!%p129_p8, %s387_s10), 1 }
  0x33   : > { %s250_s9 = sshll.u32 %s486_s10, 5 }
  0x34   : > { %s133_s20 = scalar_lea.vmem %s476_s1, %s250_s9 }
  0xb1   : > { %v151_v1 = vpop.trf.xlu0 }
  0xb2   : > { %168 = vst.msk [vmem:[%s133_s20] sm:$0xff] %vm167_vm0, %v151_v1 }
  0xb5   : > { %v152_v2 = vpop.trf.xlu0 }
  0xb6   : > { %169 = vst.msk [vmem:[%s133_s20 + $0x8] sm:$0xff] %vm167_vm0, %v152_v2 }
  0xb9   : > { %v153_v3 = vpop.trf.xlu0 }
  0xba   : > { %170 = vst.msk [vmem:[%s133_s20 + $0x10] sm:$0xff] %vm167_vm0, %v153_v3 }
  0xbd   : > { %v154_v4 = vpop.trf.xlu0 }
  0xbe   : > { %171 = vst.msk [vmem:[%s133_s20 + $0x18] sm:$0xff] %vm167_vm0, %v154_v4 }
  0xbf PF: > { %p11_p7 = scmp.ge.s32.totalorder %s390_s11, 4   ;;  %s481_s6 = smov %s347_s7 }
  0xc0   : > { %s482_s7 = smov %s351_s8  ;;  %s483_s8 = smov %s400_s14 }
  0xc1   : > { %s484_s9 = smov %s390_s11  ;;  %13 = sbr.rel (!%p11_p7) target bundleno = 3 (0x3), region = 64 }
  0xc8   :  { %193 = vsyncpa [#allocation3], 1 }
  0xc9   :  { %195 = vsyncpa [#allocation3 + $0x1], 1 }

</bundles_post_ra>
